<compile_context>
chip_gen: v5e
topology: v5e:2x2
jax: 0.10.0
libtpu: 0.0.40
codegen_flags: <defaults>
</compile_context>

<pallas_src>
import functools
import numpy as np

import jax
import jax.numpy as jnp
from jax.experimental import pallas as pl
from jax.experimental.pallas import tpu as pltpu


# ----------------------------------------------------------------------------
# Fused Pallas kernel: encoder MLP + key_transform MLP + dot-product attention
# ----------------------------------------------------------------------------

def _mlp_apply(h, w_refs, start, num_layers):
    """relu(h W0 + b0) ... W_last + b_last, reading weights from w_refs[start:]."""
    for i in range(num_layers):
        w = w_refs[start + 2 * i][...]
        b = w_refs[start + 2 * i + 1][...]
        h = jnp.dot(h, w, preferred_element_type=jnp.float32) + b
        if i < num_layers - 1:                      # ReLU on all but the last layer
            h = jnp.maximum(h, 0.0)
    return h


def _fused_encoder_kernel(*refs, n_enc_layers, n_key_layers, bb, n_ctx, n_tgt,
                          key_dim, r_dim):
    """One grid step = `bb` batch elements, fully in VMEM.

    refs = (xy_ctx, x_ctx, x_tgt, enc_w0, enc_b0, ..., key_w0, key_b0, ..., out)
    """
    xy_ref, xc_ref, xt_ref = refs[0], refs[1], refs[2]
    n_w = 2 * (n_enc_layers + n_key_layers)
    w_refs = refs[3:3 + n_w]
    out_ref = refs[3 + n_w]

    # r_i = encoder MLP([x_c, y_c])                         -> [bb*Nc, r_dim]
    r_flat = _mlp_apply(xy_ref[...], w_refs, 0, n_enc_layers)

    # queries and keys share the key_transform MLP: run one pass over the
    # row-concatenated [x_target ; x_context] block, then split.
    qk_in = jnp.concatenate([xt_ref[...], xc_ref[...]], axis=0)   # [bb*(Nt+Nc), x]
    qk = _mlp_apply(qk_in, w_refs, 2 * n_enc_layers, n_key_layers)
    q = qk[:bb * n_tgt].reshape(bb, n_tgt, key_dim)
    k = qk[bb * n_tgt:].reshape(bb, n_ctx, key_dim)
    v = r_flat.reshape(bb, n_ctx, r_dim)

    # scaled dot-product attention over context points (batched; the last-dim
    # contraction avoids materialising k.T).
    scale = 1.0 / jnp.sqrt(jnp.float32(key_dim))
    s = jnp.einsum("bqd,bkd->bqk", q, k,
                   preferred_element_type=jnp.float32) * scale     # [bb, Nt, Nc]
    s = s - jnp.max(s, axis=-1, keepdims=True)
    p = jnp.exp(s)
    denom = jnp.sum(p, axis=-1, keepdims=True)
    # approx=False keeps full f32 accuracy; flip to approx=True if a ~1e-3
    # relative error on the softmax normalisation is acceptable.
    w = p * pl.reciprocal(denom, approx=False)
    out = jnp.einsum("bqk,bkd->bqd", w, v,
                     preferred_element_type=jnp.float32)            # [bb, Nt, r]
    out_ref[...] = out.reshape(bb * n_tgt, r_dim).astype(out_ref.dtype)


def attentive_deterministic_encoder(params, x_context, y_context, x_target,
                                    batch_size, batch_block=None):
    """Fused forward pass. Inputs are [B*Nc, x], [B*Nc, y], [B*Nt, x]."""
    enc = params["encoder"]
    keyt = params["key_transform"]
    r_dim = enc[-1][0].shape[1]
    key_dim = keyt[-1][0].shape[1]
    x_dim = x_context.shape[1]
    y_dim = y_context.shape[1]

    assert x_context.shape[0] % batch_size == 0
    assert x_target.shape[0] % batch_size == 0
    n_ctx = x_context.shape[0] // batch_size
    n_tgt = x_target.shape[0] // batch_size

    # Batch block: amortize the per-grid-step overhead when the batch is large,
    # but keep >= 2 grid steps so both v7x TensorCores get work.
    if batch_block is None:
        batch_block = 1
        if batch_size > 2:
            for cand in (8, 4, 2):
                if batch_size % cand == 0 and batch_size // cand >= 2:
                    batch_block = cand
                    break
    assert batch_size % batch_block == 0, "batch_size must be a multiple of batch_block"
    grid = (batch_size // batch_block,)

    # torch.cat((x_context, y_context), dim=-1) — done once in the wrapper,
    # exactly as the PyTorch module does before calling the encoder network.
    xy_context = jnp.concatenate([x_context, y_context], axis=-1)

    n_enc_layers = len(enc)
    n_key_layers = len(keyt)
    flat_w = []
    w_specs = []
    for w, b in list(enc) + list(keyt):
        flat_w += [w, b]
        w_specs.append(pl.BlockSpec(w.shape, lambda i: (0, 0)))
        w_specs.append(pl.BlockSpec(b.shape, lambda i: (0, 0)))

    kernel = functools.partial(
        _fused_encoder_kernel,
        n_enc_layers=n_enc_layers, n_key_layers=n_key_layers,
        bb=batch_block, n_ctx=n_ctx, n_tgt=n_tgt,
        key_dim=key_dim, r_dim=r_dim)

    return pl.pallas_call(
        kernel,
        out_shape=jax.ShapeDtypeStruct((batch_size * n_tgt, r_dim), jnp.float32),
        grid=grid,
        in_specs=[
            pl.BlockSpec((batch_block * n_ctx, x_dim + y_dim), lambda i: (i, 0)),
            pl.BlockSpec((batch_block * n_ctx, x_dim), lambda i: (i, 0)),
            pl.BlockSpec((batch_block * n_tgt, x_dim), lambda i: (i, 0)),
        ] + w_specs,
        out_specs=pl.BlockSpec((batch_block * n_tgt, r_dim), lambda i: (i, 0)),
        compiler_params=pltpu.CompilerParams(
            dimension_semantics=("parallel",),
            vmem_limit_bytes=32 * 1024 * 1024),
    )(xy_context, x_context, x_target, *flat_w)


# ----------------------------------------------------------------------------
# Parameter construction (deterministic, PyTorch nn.Linear-style uniform init)
# ----------------------------------------------------------------------------

def init_linear(key, fan_in, fan_out):
    kw, kb = jax.random.split(key)
    bound = 1.0 / np.sqrt(fan_in)
    w = jax.random.uniform(kw, (fan_in, fan_out), jnp.float32, -bound, bound)
    b = jax.random.uniform(kb, (1, fan_out), jnp.float32, -bound, bound)
    return w, b


def init_vanilla_nn(key, in_dim, out_dim, hidden_dims):
    dims = [in_dim] + list(hidden_dims) + [out_dim]
    keys = jax.random.split(key, len(dims) - 1)
    return [init_linear(k, dims[i], dims[i + 1]) for i, k in enumerate(keys)]


def init_encoder(key, x_dim, y_dim, r_dim, hidden_dims):
    k_enc, k_key = jax.random.split(key)
    key_dim = hidden_dims[-1]
    return {
        # SelfAttentiveVanillaNN (self_att=False) == VanillaNN(x_dim+y_dim -> r_dim)
        "encoder": init_vanilla_nn(k_enc, x_dim + y_dim, r_dim, hidden_dims),
        # CrossAttentionNN.key_transform == VanillaNN(x_dim -> key_dim, hidden=[key_dim])
        "key_transform": init_vanilla_nn(k_key, x_dim, key_dim, [key_dim]),
    }


# ----------------------------------------------------------------------------
# Pure-JAX reference (correctness check)
# ----------------------------------------------------------------------------

def _mlp_ref(x, params):
    h = x
    for i, (w, b) in enumerate(params):
        h = h @ w + b
        if i < len(params) - 1:
            h = jnp.maximum(h, 0.0)
    return h


def _encoder_ref(params, x_context, y_context, x_target, batch_size):
    r_dim = params["encoder"][-1][0].shape[1]
    key_dim = params["key_transform"][-1][0].shape[1]
    r = _mlp_ref(jnp.concatenate([x_context, y_context], axis=-1), params["encoder"])
    q = _mlp_ref(x_target, params["key_transform"]).reshape(batch_size, -1, key_dim)
    k = _mlp_ref(x_context, params["key_transform"]).reshape(batch_size, -1, key_dim)
    v = r.reshape(batch_size, -1, r_dim)
    s = jnp.einsum("bik,bjk->bij", q, k) / jnp.sqrt(jnp.float32(key_dim))
    w = jax.nn.softmax(s, axis=-1)
    return jnp.einsum("bij,bjd->bid", w, v).reshape(-1, r_dim)


# ----------------------------------------------------------------------------
# Main
# ----------------------------------------------------------------------------

if __name__ == "__main__":
    x_dim, y_dim, r_dim = 4, 2, 32
    hidden_dims = [32, 32]
    batch_size, n_context, n_target = 2, 8, 8

    root = jax.random.PRNGKey(0)
    k_par, k_xc, k_yc, k_xt = jax.random.split(root, 4)

    params = init_encoder(k_par, x_dim, y_dim, r_dim, hidden_dims)
    x_context = jax.random.normal(k_xc, (batch_size * n_context, x_dim), jnp.float32)
    y_context = jax.random.normal(k_yc, (batch_size * n_context, y_dim), jnp.float32)
    x_target = jax.random.normal(k_xt, (batch_size * n_target, x_dim), jnp.float32)

    out = attentive_deterministic_encoder(params, x_context, y_context, x_target,
                                          batch_size)
    out = jax.block_until_ready(out)

    ref = _encoder_ref(params, x_context, y_context, x_target, batch_size)
    np.testing.assert_allclose(np.asarray(out), np.asarray(ref), rtol=1e-5, atol=1e-5)
    assert out.shape == (batch_size * n_target, r_dim)

    print("KERNEL_OK")
</pallas_src>

<mosaic_0001>
module attributes {stable_mosaic.version = 11 : i64} {
  func.func @_fused_encoder_kernel(%arg0: i32, %arg1: memref<8x6xf32, #tpu.memory_space<vmem>>, %arg2: memref<8x4xf32, #tpu.memory_space<vmem>>, %arg3: memref<8x4xf32, #tpu.memory_space<vmem>>, %arg4: memref<6x32xf32, #tpu.memory_space<vmem>>, %arg5: memref<1x32xf32, #tpu.memory_space<vmem>>, %arg6: memref<32x32xf32, #tpu.memory_space<vmem>>, %arg7: memref<1x32xf32, #tpu.memory_space<vmem>>, %arg8: memref<32x32xf32, #tpu.memory_space<vmem>>, %arg9: memref<1x32xf32, #tpu.memory_space<vmem>>, %arg10: memref<4x32xf32, #tpu.memory_space<vmem>>, %arg11: memref<1x32xf32, #tpu.memory_space<vmem>>, %arg12: memref<32x32xf32, #tpu.memory_space<vmem>>, %arg13: memref<1x32xf32, #tpu.memory_space<vmem>>, %arg14: memref<8x32xf32, #tpu.memory_space<vmem>>) attributes {dimension_semantics = [#tpu.dimension_semantics<parallel>], iteration_bounds = array<i64: 2>, scalar_prefetch = 0 : i64, scratch_operands = 0 : i64, tpu.core_type = #tpu.core_type<tc>, window_params = [{transform_indices = @transform_0, window_bounds = array<i64: 8, 6>}, {transform_indices = @transform_1, window_bounds = array<i64: 8, 4>}, {transform_indices = @transform_2, window_bounds = array<i64: 8, 4>}, {pipeline_mode = #tpu.pipeline_mode<synchronous>, transform_indices = @transform_3, window_bounds = array<i64: 6, 32>}, {pipeline_mode = #tpu.pipeline_mode<synchronous>, transform_indices = @transform_4, window_bounds = array<i64: 1, 32>}, {pipeline_mode = #tpu.pipeline_mode<synchronous>, transform_indices = @transform_5, window_bounds = array<i64: 32, 32>}, {pipeline_mode = #tpu.pipeline_mode<synchronous>, transform_indices = @transform_6, window_bounds = array<i64: 1, 32>}, {pipeline_mode = #tpu.pipeline_mode<synchronous>, transform_indices = @transform_7, window_bounds = array<i64: 32, 32>}, {pipeline_mode = #tpu.pipeline_mode<synchronous>, transform_indices = @transform_8, window_bounds = array<i64: 1, 32>}, {pipeline_mode = #tpu.pipeline_mode<synchronous>, transform_indices = @transform_9, window_bounds = array<i64: 4, 32>}, {pipeline_mode = #tpu.pipeline_mode<synchronous>, transform_indices = @transform_10, window_bounds = array<i64: 1, 32>}, {pipeline_mode = #tpu.pipeline_mode<synchronous>, transform_indices = @transform_11, window_bounds = array<i64: 32, 32>}, {pipeline_mode = #tpu.pipeline_mode<synchronous>, transform_indices = @transform_12, window_bounds = array<i64: 1, 32>}, {transform_indices = @transform_13, window_bounds = array<i64: 8, 32>}]} {
    %c0 = arith.constant 0 : index
    %c0_0 = arith.constant 0 : index
    %0 = vector.load %arg1[%c0, %c0_0] : memref<8x6xf32, #tpu.memory_space<vmem>>, vector<8x6xf32>
    %c0_1 = arith.constant 0 : index
    %c0_2 = arith.constant 0 : index
    %1 = vector.load %arg4[%c0_1, %c0_2] : memref<6x32xf32, #tpu.memory_space<vmem>>, vector<6x32xf32>
    %c0_3 = arith.constant 0 : index
    %c0_4 = arith.constant 0 : index
    %2 = vector.load %arg5[%c0_3, %c0_4] : memref<1x32xf32, #tpu.memory_space<vmem>>, vector<1x32xf32>
    %cst = arith.constant dense<0.000000e+00> : vector<8x32xf32>
    %3 = tpu.matmul %0, %1, %cst {dimension_numbers = #tpu.dot_dimension_numbers<[1], [0], [0], [1], [0, 0, 1, 1], [], []>} : vector<8x6xf32>, vector<6x32xf32>, vector<8x32xf32> -> vector<8x32xf32>
    %4 = vector.broadcast %2 : vector<1x32xf32> to vector<8x32xf32>
    %5 = arith.addf %3, %4 : vector<8x32xf32>
    %cst_5 = arith.constant 0.000000e+00 : f32
    %6 = vector.broadcast %cst_5 : f32 to vector<8x32xf32>
    %7 = arith.maximumf %5, %6 : vector<8x32xf32>
    %c0_6 = arith.constant 0 : index
    %c0_7 = arith.constant 0 : index
    %8 = vector.load %arg6[%c0_6, %c0_7] : memref<32x32xf32, #tpu.memory_space<vmem>>, vector<32x32xf32>
    %c0_8 = arith.constant 0 : index
    %c0_9 = arith.constant 0 : index
    %9 = vector.load %arg7[%c0_8, %c0_9] : memref<1x32xf32, #tpu.memory_space<vmem>>, vector<1x32xf32>
    %cst_10 = arith.constant dense<0.000000e+00> : vector<8x32xf32>
    %10 = tpu.matmul %7, %8, %cst_10 {dimension_numbers = #tpu.dot_dimension_numbers<[1], [0], [0], [1], [0, 0, 1, 1], [], []>} : vector<8x32xf32>, vector<32x32xf32>, vector<8x32xf32> -> vector<8x32xf32>
    %11 = vector.broadcast %9 : vector<1x32xf32> to vector<8x32xf32>
    %12 = arith.addf %10, %11 : vector<8x32xf32>
    %cst_11 = arith.constant 0.000000e+00 : f32
    %13 = vector.broadcast %cst_11 : f32 to vector<8x32xf32>
    %14 = arith.maximumf %12, %13 : vector<8x32xf32>
    %c0_12 = arith.constant 0 : index
    %c0_13 = arith.constant 0 : index
    %15 = vector.load %arg8[%c0_12, %c0_13] : memref<32x32xf32, #tpu.memory_space<vmem>>, vector<32x32xf32>
    %c0_14 = arith.constant 0 : index
    %c0_15 = arith.constant 0 : index
    %16 = vector.load %arg9[%c0_14, %c0_15] : memref<1x32xf32, #tpu.memory_space<vmem>>, vector<1x32xf32>
    %cst_16 = arith.constant dense<0.000000e+00> : vector<8x32xf32>
    %17 = tpu.matmul %14, %15, %cst_16 {dimension_numbers = #tpu.dot_dimension_numbers<[1], [0], [0], [1], [0, 0, 1, 1], [], []>} : vector<8x32xf32>, vector<32x32xf32>, vector<8x32xf32> -> vector<8x32xf32>
    %18 = vector.broadcast %16 : vector<1x32xf32> to vector<8x32xf32>
    %19 = arith.addf %17, %18 : vector<8x32xf32>
    %c0_17 = arith.constant 0 : index
    %c0_18 = arith.constant 0 : index
    %20 = vector.load %arg3[%c0_17, %c0_18] : memref<8x4xf32, #tpu.memory_space<vmem>>, vector<8x4xf32>
    %c0_19 = arith.constant 0 : index
    %c0_20 = arith.constant 0 : index
    %21 = vector.load %arg2[%c0_19, %c0_20] : memref<8x4xf32, #tpu.memory_space<vmem>>, vector<8x4xf32>
    %22 = tpu.concatenate %20, %21 in 0 : vector<8x4xf32>, vector<8x4xf32> -> vector<16x4xf32>
    %c0_21 = arith.constant 0 : index
    %c0_22 = arith.constant 0 : index
    %23 = vector.load %arg10[%c0_21, %c0_22] : memref<4x32xf32, #tpu.memory_space<vmem>>, vector<4x32xf32>
    %c0_23 = arith.constant 0 : index
    %c0_24 = arith.constant 0 : index
    %24 = vector.load %arg11[%c0_23, %c0_24] : memref<1x32xf32, #tpu.memory_space<vmem>>, vector<1x32xf32>
    %cst_25 = arith.constant dense<0.000000e+00> : vector<16x32xf32>
    %25 = tpu.matmul %22, %23, %cst_25 {dimension_numbers = #tpu.dot_dimension_numbers<[1], [0], [0], [1], [0, 0, 1, 1], [], []>} : vector<16x4xf32>, vector<4x32xf32>, vector<16x32xf32> -> vector<16x32xf32>
    %26 = vector.broadcast %24 : vector<1x32xf32> to vector<16x32xf32>
    %27 = arith.addf %25, %26 : vector<16x32xf32>
    %cst_26 = arith.constant 0.000000e+00 : f32
    %28 = vector.broadcast %cst_26 : f32 to vector<16x32xf32>
    %29 = arith.maximumf %27, %28 : vector<16x32xf32>
    %c0_27 = arith.constant 0 : index
    %c0_28 = arith.constant 0 : index
    %30 = vector.load %arg12[%c0_27, %c0_28] : memref<32x32xf32, #tpu.memory_space<vmem>>, vector<32x32xf32>
    %c0_29 = arith.constant 0 : index
    %c0_30 = arith.constant 0 : index
    %31 = vector.load %arg13[%c0_29, %c0_30] : memref<1x32xf32, #tpu.memory_space<vmem>>, vector<1x32xf32>
    %cst_31 = arith.constant dense<0.000000e+00> : vector<16x32xf32>
    %32 = tpu.matmul %29, %30, %cst_31 {dimension_numbers = #tpu.dot_dimension_numbers<[1], [0], [0], [1], [0, 0, 1, 1], [], []>} : vector<16x32xf32>, vector<32x32xf32>, vector<16x32xf32> -> vector<16x32xf32>
    %33 = vector.broadcast %31 : vector<1x32xf32> to vector<16x32xf32>
    %34 = arith.addf %32, %33 : vector<16x32xf32>
    %35 = vector.extract_strided_slice %34 {offsets = [0, 0], sizes = [8, 32], strides = [1, 1]} : vector<16x32xf32> to vector<8x32xf32>
    %36 = vector.shape_cast %35 : vector<8x32xf32> to vector<1x8x32xf32>
    %37 = vector.extract_strided_slice %34 {offsets = [8, 0], sizes = [8, 32], strides = [1, 1]} : vector<16x32xf32> to vector<8x32xf32>
    %38 = vector.shape_cast %37 : vector<8x32xf32> to vector<1x8x32xf32>
    %39 = vector.shape_cast %19 : vector<8x32xf32> to vector<1x8x32xf32>
    %cst_32 = arith.constant 3.200000e+01 : f32
    %40 = math.sqrt %cst_32 : f32
    %cst_33 = arith.constant 1.000000e+00 : f32
    %41 = arith.divf %cst_33, %40 : f32
    "tpu.trace_start"() <{level = 10 : i32, message = "bqd,bkd->bqk"}> : () -> ()
    %cst_34 = arith.constant dense<0.000000e+00> : vector<1x8x8xf32>
    %42 = tpu.matmul %36, %38, %cst_34 {dimension_numbers = #tpu.dot_dimension_numbers<[2], [2], [1], [1], [0, 0, 0, 1, 1, 1], [0], [0]>} : vector<1x8x32xf32>, vector<1x8x32xf32>, vector<1x8x8xf32> -> vector<1x8x8xf32>
    "tpu.trace_stop"() : () -> ()
    %43 = vector.broadcast %41 : f32 to vector<1x8x8xf32>
    %44 = arith.mulf %42, %43 : vector<1x8x8xf32>
    %cst_35 = arith.constant dense<0xFF800000> : vector<1x8xf32>
    %45 = vector.multi_reduction <maximumf>, %44, %cst_35 [2] : vector<1x8x8xf32> to vector<1x8xf32>
    %46 = vector.shape_cast %45 : vector<1x8xf32> to vector<1x8x1xf32>
    %47 = vector.broadcast %46 : vector<1x8x1xf32> to vector<1x8x8xf32>
    %48 = arith.subf %44, %47 : vector<1x8x8xf32>
    %49 = math.exp %48 : vector<1x8x8xf32>
    %cst_36 = arith.constant dense<0.000000e+00> : vector<1x8xf32>
    %50 = vector.multi_reduction <add>, %49, %cst_36 [2] : vector<1x8x8xf32> to vector<1x8xf32>
    %51 = vector.shape_cast %50 : vector<1x8xf32> to vector<1x8x1xf32>
    %52 = tpu.reciprocal %51 : vector<1x8x1xf32> -> vector<1x8x1xf32>
    %53 = vector.broadcast %52 : vector<1x8x1xf32> to vector<1x8x8xf32>
    %54 = arith.mulf %49, %53 : vector<1x8x8xf32>
    "tpu.trace_start"() <{level = 10 : i32, message = "bqk,bkd->bqd"}> : () -> ()
    %cst_37 = arith.constant dense<0.000000e+00> : vector<1x8x32xf32>
    %55 = tpu.matmul %54, %39, %cst_37 {dimension_numbers = #tpu.dot_dimension_numbers<[2], [1], [1], [2], [0, 0, 0, 1, 1, 2], [0], [0]>} : vector<1x8x8xf32>, vector<1x8x32xf32>, vector<1x8x32xf32> -> vector<1x8x32xf32>
    "tpu.trace_stop"() : () -> ()
    %56 = vector.shape_cast %55 : vector<1x8x32xf32> to vector<8x32xf32>
    %c0_38 = arith.constant 0 : index
    %c0_39 = arith.constant 0 : index
    %57 = vector.load %arg14[%c0_38, %c0_39] : memref<8x32xf32, #tpu.memory_space<vmem>>, vector<8x32xf32>
    tpu.vector_store %arg14[%c0_38, %c0_39], %56 {strides = array<i32>} : memref<8x32xf32, #tpu.memory_space<vmem>>, vector<8x32xf32>,
    return
  }
  func.func @transform_0(%arg0: i32) -> (i32, i32) {
    %c0_i32 = arith.constant 0 : i32
    %c0_i32_0 = arith.constant 0 : i32
    return %arg0, %c0_i32 : i32, i32
  }
  func.func @transform_1(%arg0: i32) -> (i32, i32) {
    %c0_i32 = arith.constant 0 : i32
    %c0_i32_0 = arith.constant 0 : i32
    return %arg0, %c0_i32 : i32, i32
  }
  func.func @transform_2(%arg0: i32) -> (i32, i32) {
    %c0_i32 = arith.constant 0 : i32
    %c0_i32_0 = arith.constant 0 : i32
    return %arg0, %c0_i32 : i32, i32
  }
  func.func @transform_3(%arg0: i32) -> (i32, i32) {
    %c0_i32 = arith.constant 0 : i32
    %c0_i32_0 = arith.constant 0 : i32
    %c0_i32_1 = arith.constant 0 : i32
    return %c0_i32, %c0_i32_0 : i32, i32
  }
  func.func @transform_4(%arg0: i32) -> (i32, i32) {
    %c0_i32 = arith.constant 0 : i32
    %c0_i32_0 = arith.constant 0 : i32
    %c0_i32_1 = arith.constant 0 : i32
    return %c0_i32, %c0_i32_0 : i32, i32
  }
  func.func @transform_5(%arg0: i32) -> (i32, i32) {
    %c0_i32 = arith.constant 0 : i32
    %c0_i32_0 = arith.constant 0 : i32
    %c0_i32_1 = arith.constant 0 : i32
    return %c0_i32, %c0_i32_0 : i32, i32
  }
  func.func @transform_6(%arg0: i32) -> (i32, i32) {
    %c0_i32 = arith.constant 0 : i32
    %c0_i32_0 = arith.constant 0 : i32
    %c0_i32_1 = arith.constant 0 : i32
    return %c0_i32, %c0_i32_0 : i32, i32
  }
  func.func @transform_7(%arg0: i32) -> (i32, i32) {
    %c0_i32 = arith.constant 0 : i32
    %c0_i32_0 = arith.constant 0 : i32
    %c0_i32_1 = arith.constant 0 : i32
    return %c0_i32, %c0_i32_0 : i32, i32
  }
  func.func @transform_8(%arg0: i32) -> (i32, i32) {
    %c0_i32 = arith.constant 0 : i32
    %c0_i32_0 = arith.constant 0 : i32
    %c0_i32_1 = arith.constant 0 : i32
    return %c0_i32, %c0_i32_0 : i32, i32
  }
  func.func @transform_9(%arg0: i32) -> (i32, i32) {
    %c0_i32 = arith.constant 0 : i32
    %c0_i32_0 = arith.constant 0 : i32
    %c0_i32_1 = arith.constant 0 : i32
    return %c0_i32, %c0_i32_0 : i32, i32
  }
  func.func @transform_10(%arg0: i32) -> (i32, i32) {
    %c0_i32 = arith.constant 0 : i32
    %c0_i32_0 = arith.constant 0 : i32
    %c0_i32_1 = arith.constant 0 : i32
    return %c0_i32, %c0_i32_0 : i32, i32
  }
  func.func @transform_11(%arg0: i32) -> (i32, i32) {
    %c0_i32 = arith.constant 0 : i32
    %c0_i32_0 = arith.constant 0 : i32
    %c0_i32_1 = arith.constant 0 : i32
    return %c0_i32, %c0_i32_0 : i32, i32
  }
  func.func @transform_12(%arg0: i32) -> (i32, i32) {
    %c0_i32 = arith.constant 0 : i32
    %c0_i32_0 = arith.constant 0 : i32
    %c0_i32_1 = arith.constant 0 : i32
    return %c0_i32, %c0_i32_0 : i32, i32
  }
  func.func @transform_13(%arg0: i32) -> (i32, i32) {
    %c0_i32 = arith.constant 0 : i32
    %c0_i32_0 = arith.constant 0 : i32
    return %arg0, %c0_i32 : i32, i32
  }
}

</mosaic_0001>

<bundles_post_ra>
// kernel: tpu_custom_call.1
= control target key start
LH: loop header
LB: loop body
LE: loop exit
PB: predicated region body
PF: predicated region fallthrough
CT: control target
= control target key end

     0   :  { %s1346_s0 = inlined_call_operand.vmem [shape: f32[16,6], index: 0, kind: input, shape index: {}]   ;;  %s1347_s1 = inlined_call_operand.vmem [shape: f32[16,4], index: 1, kind: input, shape index: {}]   ;;  %s1348_s2 = inlined_call_operand.vmem [shape: f32[16,4], index: 2, kind: input, shape index: {}]   ;;  %s1349_s3 = inlined_call_operand.vmem [shape: f32[6,32], index: 3, kind: input, shape index: {}]   ;;  %s1350_s4 = inlined_call_operand.vmem [shape: f32[1,32], index: 4, kind: input, shape index: {}]   ;;  %s1351_s5 = inlined_call_operand.vmem [shape: f32[32,32], index: 5, kind: input, shape index: {}]   ;;  %s1352_s6 = inlined_call_operand.vmem [shape: f32[1,32], index: 6, kind: input, shape index: {}]   ;;  %s1353_s7 = inlined_call_operand.hbm [shape: f32[32,32], index: 7, kind: input, shape index: {}]   ;;  %s1354_s8 = inlined_call_operand.vmem [shape: f32[1,32], index: 8, kind: input, shape index: {}]   ;;  %s1355_s9 = inlined_call_operand.vmem [shape: f32[4,32], index: 9, kind: input, shape index: {}]   ;;  %s1356_s10 = inlined_call_operand.vmem [shape: f32[1,32], index: 10, kind: input, shape index: {}]   ;;  %s1357_s11 = inlined_call_operand.hbm [shape: f32[32,32], index: 11, kind: input, shape index: {}]   ;;  %s1358_s12 = inlined_call_operand.vmem [shape: f32[1,32], index: 12, kind: input, shape index: {}]   ;;  %s1359_s13 = inlined_call_operand.hbm [shape: f32[16,32], index: 13, kind: output, shape index: {}]  }
   0x1   :  { %1364 = sst [smem:[#allocation15_spill]] %s1346_s0 }
   0x2   :  { %18 = vsyncpa [#allocation3], 0 }
   0x3   :  { %19 = vsyncpa [#allocation6], 0 }
   0x4   :  { %20 = vsyncpa [#allocation4], 0 }
   0x5   :  { %22 = vsyncpa [#allocation4 + $0x1], 0  ;;  %s1185_s25 = smov 0   ;;  %s1187_s26 = smov 0  }
   0x6   :  { %s1189_s27 = smov 0   ;;  %s1191_s28 = smov 0  }
   0x7 LB: > { %1365 = sst [smem:[#allocation11_spill]] %s1105_s27  ;;  %s1206_s29 = sadd.s32 4294967295, %s1109_s28   ;;  %s1109_s28 = sphi %s1191_s28, %s1374_s28   ;;  %s1105_s27 = sphi %s1189_s27, %s1376_s27   ;;  %s1101_s26 = sphi %s1187_s26, %s1378_s26   ;;  %s1097_s25 = sphi %s1185_s25, %s1377_s25  }
   0x8   : > { %s880_s30 = sadd.s32 4294967294, %s1109_s28   ;;  %s1210_s14 = sadd.s32 1, %s1109_s28  }
   0x9   : > { %1366 = sst [smem:[#allocation12_spill]] %s1210_s14  ;;  %s323_s15 = sadd.s32 1, %s1105_s27 }
   0xa   : > { %s320_s16 = ssub.s32 %s1109_s28, %s1210_s14  ;;  %p333_p0 = scmp.ne.s32.totalorder %s1105_s27, %s1101_s26 }
   0xb   : > { %p321_p1 = scmp.eq.s32.totalorder %s320_s16, 0  ;;  %p334_p2 = scmp.eq.s32.totalorder %s1206_s29, 1 }
   0xc   : > { %p339_p3 = scmp.ne.s32.totalorder %s1101_s26, %s1097_s25  ;;  %p340_p4 = scmp.eq.s32.totalorder %s880_s30, 1 }
   0xd   : > { %s1221_s17 = scalar_select %p321_p1, %s1105_s27, %s323_s15  }
   0xe   : > { %p1223_p5 = por %p334_p2, %p333_p0  ;;  %p1227_p6 = por %p340_p4, %p339_p3 }
   0xf   : > { %1367 = sst [smem:[#allocation13_spill]] %s1221_s17  ;;  %p881_p7 = scmp.ge.s32.totalorder %s1109_s28, 1 }
  0x10   : > { %s1369_s19 = scalar_select %p1227_p6, 1, 0 }
  0x11   : > { %p347_p8 = scmp.lt.s32.totalorder %s1109_s28, 3  ;;  %p929_p9 = scmp.eq.s32.totalorder %s1206_s29, 0 }
  0x12   : > { %1370 = sst [smem:[#allocation14_spill]] %s1369_s19  ;;  %s370_s23 = sshll.u32 %s1353_s7, 4  ;;  %s371_s23 = int_to_ptr.hbm [resolvable:$true] %s370_s23 }
  0x13   : > { %p1234_p10 = pnand %p881_p7, %p347_p8  ;;  %s1111_s24 = smov [#allocation2]  }
  0x14   : > { %s372_s30 = sshll.u32 %s1111_s24, 4  ;;  %s393_s17 = sshll.u32 %s1357_s11, 4  ;;  %s373_s30 = int_to_ptr.vmem [resolvable:$true] %s372_s30  ;;  %s394_s17 = int_to_ptr.hbm [resolvable:$true] %s393_s17 }
  0x15   : > { %p918_p11 = pneg %p1234_p10  ;;  %s1112_s27 = smov 128  }
  0x16   : > { %s1113_s14 = smov 8   ;;  %s1114_s19 = smov [#allocation5]  }
  0x17   : > { %p919_p12 = pnand %p929_p9, %p918_p11  ;;  %s395_s21 = sshll.u32 %s1114_s19, 4  ;;  %s396_s21 = int_to_ptr.vmem [resolvable:$true] %s395_s21 }
  0x18   : > { %435 = sbr.rel (%p1234_p10) target bundleno = 841 (0x349), region = 72 }
  0x19   : > { %921 = dma.hbm_to_vmem [thread:$0]  (!%p919_p12), %s371_s23, 512, %s373_s30, [#allocation3], %s1112_s27, %s1112_s27, %s1113_s14  }
  0x1a   : > { %924 = dma.hbm_to_vmem [thread:$0]  (!%p919_p12), %s394_s17, 512, %s396_s21, [#allocation6], %s1112_s27, %s1112_s27, %s1113_s14  }
  0x1d   : > { %1084 = dma.done.wait (%p929_p9), [#allocation3], 512  }
  0x1e   : > { %1086 = vsyncadd (%p929_p9), [#allocation3], 4294966784 }
  0x1f   : > { %1088 = dma.done.wait (%p929_p9), [#allocation6], 512  }
  0x20   : > { %1090 = vsyncadd (%p929_p9), [#allocation6], 4294966784  ;;  %p492_p13 = scmp.lt.s32.totalorder %s1206_s29, 1  ;;  %vm617_vm0 = vcmask 1043456   ;;  %vm610_vm1 = vcmask 31744   ;;  %vm514_vm2 = vcmask 1045504  }
  0x21   : > { %s1372_s0 = sld [smem:[#allocation15_spill]]  ;;  %v605_v0 = vld [vmem:[%s1355_s9] sm:$0xf]  ;;  %vm510_vm3 = vcmask 48128   ;;  %v649_v4 = vld [vmem:[#allocation5 + $0x18] sm:$0xff]  ;;  %v648_v6 = vld [vmem:[#allocation5 + $0x10] sm:$0xff] }
  0x22   : > { %s493_s19 = scalar_select %p492_p13, %s1206_s29, 1  ;;  %896 = vmatpush.msk.msra.mxu3 %vm617_vm0, %v605_v0  ;;  %v505_v2 = vld [vmem:[%s1349_s3] sm:$0x3f]  ;;  %v647_v7 = vld [vmem:[#allocation5 + $0x8] sm:$0xff]  ;;  %v542_v9 = vld [vmem:[%s1351_s5 + $0x18] sm:$0xff]  ;;  %vm547_vm4 = vcmask 261120  }
  0x23   : > { %892 = vmatpush.msk.msra.mxu0 %vm514_vm2, %v505_v2  ;;  %v646_v8 = vld [vmem:[#allocation5] sm:$0xff]  ;;  %v541_v10 = vld [vmem:[%s1351_s5 + $0x10] sm:$0xff]  ;;  %563 = vmatpush.msra.mxu1 %v542_v9  ;;  %v540_v11 = vld [vmem:[%s1351_s5 + $0x8] sm:$0xff]  ;;  %vm710_vm5 = vcmask 64512   ;;  %s489_s15 = sand.u32 1, %s1101_s26   ;;  %s905_s21 = sshll.u32 %s1206_s29, 3 }
  0x24   : > { %s889_s27 = sshll.u32 %s493_s19, 3  ;;  %v539_v12 = vld [vmem:[%s1351_s5] sm:$0xff]  ;;  %v575_v24 = vld [vmem:[#allocation2 + $0x18] sm:$0xff]  ;;  %v574_v25 = vld [vmem:[#allocation2 + $0x10] sm:$0xff]  ;;  %s888_s16 = sshll.u32 %s489_s15, 3 }
  0x25   : > { %s503_s20 = scalar_lea.vmem %s1348_s2, %s889_s27  ;;  %s499_s17 = scalar_lea.vmem %s1347_s1, %s889_s27  ;;  %672 = vmatpush.msrb.mxu0 %v649_v4  ;;  %564 = vmatpush.msra.mxu1 %v541_v10  ;;  %v971_v13 = vld [vmem:[%s1350_s4] ss:$0 sm:$0xff]  ;;  %v573_v26 = vld [vmem:[#allocation2 + $0x8] sm:$0xff] }
  0x26   : > { %v603_v1 = vld [vmem:[%s503_s20] sm:$0xff]  ;;  %595 = vmatpush.msra.mxu2 %v575_v24  ;;  %s491_s20 = scalar_lea.vmem [#allocation7], %s888_s16 }
  0x27   : > { %s495_s24 = scalar_lea.vmem %s1372_s0, %s889_s27  ;;  %897 = vmatmul.msk.f32.vlgmr.msra.gmra.mxu3 %vm610_vm1, %v603_v1  ;;  %v604_v5 = vld [vmem:[%s499_s17] sm:$0xff]  ;;  %673 = vmatpush.msrb.mxu0 %v648_v6  ;;  %s770_s17 = scalar_lea.hbm %s1359_s13, %s905_s21 }
  0x28   : > { %v504_v3 = vld [vmem:[%s495_s24] sm:$0xff]  ;;  %565 = vmatpush.msra.mxu1 %v540_v11  ;;  %596 = vmatpush.msra.mxu2 %v574_v25  ;;  %s772_s22 = sshll.u32 %s491_s20, 4  ;;  %s774_s23 = sshll.u32 %s770_s17, 4  ;;  %s773_s22 = int_to_ptr.vmem [resolvable:$true] %s772_s22  ;;  %s775_s23 = int_to_ptr.hbm [resolvable:$true] %s774_s23 }
  0x29   : > { %893 = vmatmul.msk.f32.vlgmr.msra.gmra.mxu0 %vm510_vm3, %v504_v3  ;;  %v970_v16 = vld [vmem:[%s1356_s10] ss:$0 sm:$0xff]  ;;  %s760_s24 = scalar_lea.sflag [#allocation4], %s489_s15  ;;  %s1053_s27 = sshra.s32 %s775_s23, 4  ;;  %s1054_s27 = int_to_ptr.hbm [resolvable:$true] %s1053_s27 }
  0x2a   : > { %674 = vmatpush.msrb.mxu0 %v647_v7  ;;  %566 = vmatpush.msra.mxu1 %v539_v12  ;;  %v572_v27 = vld [vmem:[#allocation2] sm:$0xff]  ;;  %s1055_s30 = scalar_lea.hbm %s1054_s27, 8  ;;  %s1059_s21 = scalar_lea.hbm %s1359_s13, 16 }
  0x2b   : > { %597 = vmatpush.msra.mxu2 %v573_v26  ;;  %v973_v28 = vld [vmem:[%s1352_s6] ss:$0 sm:$0xff]  ;;  %p1056_p0 = scmp.ne.s32.totalorder %s1054_s27, %s1055_s30  ;;  %p1060_p3 = scmp.lt.s32.totalorder %s1054_s27, %s1359_s13 }
  0x2c   : > { %675 = vmatpush.msrb.mxu0 %v646_v8  ;;  %v972_v33 = vld [vmem:[%s1358_s12] ss:$0 sm:$0xff]  ;;  %p1061_p4 = scmp.lt.s32.totalorder %s1059_s21, %s1055_s30 }
  0x2d   : > { %598 = vmatpush.msra.mxu2 %v572_v27  ;;  %v974_v40 = vld [vmem:[%s1354_s8] ss:$0 sm:$0xff]  ;;  %p1057_p1 = pnand %p1056_p0, %p1223_p5 }
  0x2e   : > { %p1062_p7 = por %p1061_p4, %p1060_p3 }
  0x2f   : > { %898 = vmatmul.msk.f32.gmra.mxu3 %vm610_vm1, %v604_v5  ;;  %p1058_p2 = pneg %p1057_p1 }
  0x31   : > { %p1063_p8 = pnand %p1062_p7, %p1058_p2 }
  0xa6   : > { %v535_v14 = vpop.f32.mrf.mxu0 }
  0xa7   : > { %v536_v15 = vadd.f32 %v971_v13, %v535_v14 }
  0xa9   : > { %v538_v17 = vmax.f32 %v536_v15, 0.0 }
  0xaa   : > { %v638_v18 = vpop.f32.mrf.mxu3 }
  0xab   : > { %894 = vmatmul.msk.f32.vlgmr.msra.gmra.mxu1 %vm547_vm4, %v538_v17  ;;  %v639_v19 = vadd.f32 %v970_v16, %v638_v18 }
  0xad   : > { %v644_v20 = vmax.f32 %v639_v19, 0.0 }
  0xaf   : > { %899 = vmatmul.msk.f32.vlgmr.msrb.gmra.mxu0 %vm547_vm4, %v644_v20 }
  0xb2   : > { %v641_v21 = vpop.f32.mrf.mxu3 }
  0xb3   : > { %v642_v22 = vadd.f32 %v970_v16, %v641_v21 }
  0xb5   : > { %v645_v23 = vmax.f32 %v642_v22, 0.0 }
  0xb7   : > { %900 = vmatmul.msk.f32.gmra.mxu0 %vm547_vm4, %v645_v23 }
 0x128   : > { %v568_v29 = vpop.f32.mrf.mxu1 }
 0x129   : > { %v569_v30 = vadd.f32 %v973_v28, %v568_v29 }
 0x12b   : > { %v571_v31 = vmax.f32 %v569_v30, 0.0 }
 0x12c   : > { %v677_v32 = vpop.f32.mrf.mxu0 }
 0x12d   : > { %895 = vmatmul.msk.f32.vlgmr.msra.gmra.mxu2 %vm547_vm4, %v571_v31  ;;  %v678_v36 = vadd.f32 %v972_v33, %v677_v32 }
 0x134   : > { %v680_v34 = vpop.f32.mrf.mxu0 }
 0x135   : > { %v681_v35 = vadd.f32 %v972_v33, %v680_v34 }
 0x137   : > { %901 = vmatpush.xpose.msk.msrb.mxu1 %vm547_vm4, %v681_v35 }
 0x13a   : > { %902 = vmatmul.msk.f32.vlgmr.msrb.gmra.mxu1 %vm547_vm4, %v678_v36 }
 0x1b0   : > { %v600_v41 = vpop.f32.mrf.mxu2 }
 0x1b1   : > { %v601_v42 = vadd.f32 %v974_v40, %v600_v41 }
 0x1b3   : > { %753 = vmatpush.msrb.mxu2 %v601_v42 }
 0x1b7   : > { %v706_v37 = vpop.f32.mrf.mxu1 }
 0x1b8   : > { %v709_v38 = vmul.f32 0.17677669, %v706_v37 }
 0x1ba   : > { %v711_v39 = vsel %vm710_vm5, %v709_v38, -inf }
 0x1bb   : > { %712 = vmax.xlane.f32.xlu0 %v711_v39 }
 0x22e   : > { %v713_v43 = vpop.xlane.xlu0 %712 }
 0x22f   : > { %v714_v44 = vsub.f32 %v709_v38, %v713_v43 }
 0x231   : > { %v715_v45 = vmul.f32 1.442695, %v714_v44 }
 0x233   : > { %975 = vpow2.f32 %v715_v45 }
 0x239   : > { %v976_v46 = vpop.eup %975 }
 0x23a   : > { %v717_v47 = vsel %vm710_vm5, %v976_v46, 0.0 }
 0x23b   : > { %718 = vadd.xlane.f32.xlu0 %v717_v47 }
 0x2ae   : > { %v719_v48 = vpop.xlane.xlu0 %718 }
 0x2af   : > { %977 = vrcp.f32 %v719_v48  ;;  %v731_v52 = vand.u32 2147483648, %v719_v48  ;;  %v729_v54 = vand.u32 2147483647, %v719_v48  ;;  %vm725_vm7 = vweird.f32 %v719_v48 }
 0x2b1   : > { %v732_v56 = vor.u32 1.1754944e-38, %v731_v52  ;;  %vm730_vm9 = vcmp.eq.f32.partialorder %v729_v54, 8.507059e+37 }
 0x2b5   : > { %v978_v49 = vpop.eup %977 }
 0x2b6   : > { %v721_v50 = vmul.f32 %v978_v49, %v719_v48  ;;  %vm726_vm6 = vweird.f32 %v978_v49 }
 0x2b7   : > { %vm727_vm8 = vmor %vm725_vm7, %vm726_vm6 }
 0x2b8   : > { %v722_v51 = vsub.f32 1.0, %v721_v50 }
 0x2ba   : > { %v723_v53 = vmul.f32 %v978_v49, %v722_v51 }
 0x2bc   : > { %v724_v55 = vadd.f32 %v978_v49, %v723_v53 }
 0x2be   : > { %v728_v57 = vsel %vm727_vm8, %v978_v49, %v724_v55 }
 0x2bf   : > { %v733_v58 = vsel %vm730_vm9, %v732_v56, %v728_v57 }
 0x2c0   : > { %v734_v59 = vmul.f32 %v976_v46, %v733_v58 }
 0x2c2   : > { %903 = vmatmul.msk.f32.vlgmr.msrb.gmra.mxu2 %vm710_vm5, %v734_v59 }
 0x345   : > { %v755_v60 = vpop.f32.mrf.mxu2 }
 0x346   : > { %758 = vst.msk [vmem:[%s491_s20] sm:$0xff] %vm547_vm4, %v755_v60 }
 0x347   : > { %1066 = shalt.err (!%p1063_p8)
}
 0x348   : > { %916 = dma.vmem_to_hbm [thread:$0]  (%p1223_p5), %s773_s22, 128, %s775_s23, %s760_s24  }
 0x349 PF: > { %p933_p9 = scmp.ge.s32.totalorder %s1109_s28, 2  ;;  %s786_s14 = sand.u32 1, %s1097_s25  }
 0x34a   : > { %s787_s0 = scalar_lea.sflag [#allocation4], %s786_s14 }
 0x34b   : > { %p926_p10 = pnand %p933_p9, %p1227_p6 }
 0x34d   : > { %p927_p11 = pneg %p926_p10 }
 0x34f   : > { %1092 = dma.done.wait (%p927_p11), %s787_s0, 128  }
 0x350   : > { %1094 = vsyncadd (%p927_p11), %s787_s0, 4294967168  ;;  %s1374_s28 = sld [smem:[#allocation12_spill]]  ;;  %s1377_s25 = smov %s1101_s26 }
 0x351   : > { %s1375_s17 = sld [smem:[#allocation11_spill]] }
 0x352   : > { %s1376_s27 = sld [smem:[#allocation13_spill]] }
 0x356   : > { %p25_p12 = scmp.ge.s32.totalorder %s1374_s28, 4  }
 0x357   : > { %s1378_s26 = smov %s1375_s17 }
 0x358   :  { %27 = sbr.rel (!%p25_p12) target bundleno = 7 (0x7), region = 122 }
 0x35d   :  { %793 = vsyncpa [#allocation3], 1 }
 0x35e   :  { %795 = vsyncpa [#allocation3 + $0x1], 1 }
 0x35f   :  { %796 = vsyncpa [#allocation6], 1 }
 0x360   :  { %797 = vsyncpa [#allocation4], 1 }
 0x361   :  { %799 = vsyncpa [#allocation4 + $0x1], 1 }

</bundles_post_ra>
